<compile_context>
chip_gen: v7x
topology: tpu7x:2x2x1
jax: 0.10.0
libtpu: 0.0.40
codegen_flags: <defaults>
</compile_context>

<pallas_src>
import functools

import jax
import jax.numpy as jnp
from jax import lax
from jax.experimental import pallas as pl
from jax.experimental.pallas import tpu as pltpu


def _round_up(x, m):
    return ((x + m - 1) // m) * m


def _masked_ce_kernel(x_ref, tgt_ref, out_ref, *, n_rows, exact_argmax):
    # x_ref   : VMEM (TM, C) native dtype  -- logits rows (cast to f32 in-kernel)
    # tgt_ref : VMEM (TM, 1) int32         -- class index, or -1 sentinel for masked rows
    # out_ref : VMEM (1, 1, 128) float32   -- per-tile partials: lane 0 = loss_sum, lane 1 = t_sum
    x = x_ref[...].astype(jnp.float32)                 # cast on the VPU, not in HBM
    tgt = tgt_ref[...]                                 # (TM, 1)
    TM, C = x.shape

    # validity: sequence mask (sentinel) AND in-bounds row (last tile may read OOB garbage)
    row = pl.program_id(0) * TM + lax.broadcasted_iota(jnp.int32, (TM, 1), 0)
    valid = jnp.logical_and(tgt >= 0, row < n_rows)    # (TM, 1) bool

    # ---- cross entropy (no reduction): lse(x) - x[target] ----
    xmax = jnp.max(x, axis=-1, keepdims=True)                                   # (TM, 1)
    lse = jnp.log(jnp.sum(jnp.exp(x - xmax), axis=-1, keepdims=True)) + xmax    # (TM, 1)

    col = lax.broadcasted_iota(jnp.int32, (TM, C), 1)                           # (TM, C)
    # fused target-logit pass (exactly one column matches a valid target)
    tgt_logit = jnp.max(jnp.where(col == tgt, x, -jnp.inf),
                        axis=-1, keepdims=True)                                 # (TM, 1)
    losses = lse - tgt_logit                                                    # (TM, 1)

    # ---- prediction correctness ----
    if exact_argmax:
        # first maximal index, matches torch.max / jnp.argmax
        pred = jnp.min(jnp.where(x == xmax, col, C), axis=-1, keepdims=True)    # (TM, 1)
        correct = pred == tgt
    else:
        # cheaper path (one fewer lane reduce); differs only when a non-target
        # column exactly ties the target's maximum logit.
        correct = tgt_logit == xmax

    # ---- masked partial reductions (where, not multiply: robust to inf/NaN rows) ----
    loss_part = jnp.sum(jnp.where(valid, losses, 0.0))
    t_part = jnp.sum(jnp.where(jnp.logical_and(correct, valid), 1.0, 0.0))

    # ---- write the two scalars into lanes 0/1 of a (1,1,128) output block ----
    lane = lax.broadcasted_iota(jnp.int32, (1, 1, 128), 2)
    out_ref[...] = jnp.where(lane == 0, loss_part,
                             jnp.where(lane == 1, t_part, 0.0))


def masked_cross_entropy_loss(inputs, target, lengths, *, tile_rows=None, exact_argmax=True):
    """inputs: (B, T, C) float, target: (B, T) int, lengths: (B,) int.
    Returns (masked mean CE loss, f = sum((pred!=tgt)*mask), t = sum((pred==tgt)*mask))."""
    B, T, C = inputs.shape
    N = B * T
    lengths = lengths.astype(jnp.int32)

    # sequence mask (same as torch sequence_mask); mask_sum computed here, not in-kernel.
    mask2d = jnp.arange(T, dtype=jnp.int32)[None, :] < lengths[:, None]          # (B, T) bool
    mask_sum = jnp.sum(mask2d.astype(jnp.float32))

    # Stream logits in their native dtype: reshape only, no upcast copy in HBM.
    x = inputs.reshape(N, C)
    # Merge the mask into the target stream: masked rows get the -1 sentinel.
    tgt = jnp.where(mask2d.reshape(N), target.reshape(N).astype(jnp.int32), -1).reshape(N, 1)

    itemsize = jnp.dtype(x.dtype).itemsize
    # sublane packing multiple: 8 for f32, 16 for bf16, 32 for int8/fp8
    mult = max(8, 32 // max(1, itemsize))

    # ---- pick the row tile: ~4 MiB of native-dtype logits per pipeline buffer ----
    if tile_rows is None:
        budget_bytes = 4 * 1024 * 1024
        budget_rows = max(mult, budget_bytes // max(1, C * itemsize))
        tile_rows = min(32768, budget_rows)
        # keep >= 2 tiles when possible so the "parallel" axis spans both v7x TensorCores
        if N > 2 * mult:
            tile_rows = min(tile_rows, _round_up(pl.cdiv(N, 2), mult))
    TM = min(int(tile_rows), _round_up(N, mult))
    TM = max(mult, (TM // mult) * mult)
    num_tiles = pl.cdiv(N, TM)

    cost = pl.CostEstimate(
        flops=6 * N * C,
        transcendentals=N * C + N,
        bytes_accessed=N * C * itemsize + 4 * N + 4 * num_tiles * 128,
    )

    partials = pl.pallas_call(
        functools.partial(_masked_ce_kernel, n_rows=N, exact_argmax=exact_argmax),
        out_shape=jax.ShapeDtypeStruct((num_tiles, 1, 128), jnp.float32),
        grid=(num_tiles,),
        in_specs=[
            pl.BlockSpec((TM, C), lambda i: (i, 0)),
            pl.BlockSpec((TM, 1), lambda i: (i, 0)),
        ],
        out_specs=pl.BlockSpec((1, 1, 128), lambda i: (i, 0, 0)),
        compiler_params=pltpu.CompilerParams(
            dimension_semantics=("parallel",),       # no cross-step accumulator -> parallel
            vmem_limit_bytes=44 * 1024 * 1024,       # headroom on v7x's 64 MiB VMEM
        ),
        cost_estimate=cost,
    )(x, tgt)

    loss_sum = jnp.sum(partials[:, 0, 0])
    t_sum = jnp.sum(partials[:, 0, 1])
    f_sum = mask_sum - t_sum
    # NOTE: mask_sum == 0 yields NaN, matching the PyTorch module's 0/0 behavior.
    return loss_sum / mask_sum, f_sum, t_sum


def _reference(inputs, target, lengths):
    B, T, C = inputs.shape
    logits = inputs.reshape(B * T, C).astype(jnp.float32)
    tgt = target.reshape(B * T)
    mask = (jnp.arange(T)[None, :] < lengths[:, None]).astype(jnp.float32).reshape(B * T)
    logp = jax.nn.log_softmax(logits, axis=-1)
    losses = -logp[jnp.arange(B * T), tgt]
    pred = jnp.argmax(logits, axis=-1)
    f = jnp.sum((pred != tgt).astype(jnp.float32) * mask)
    t = jnp.sum((pred == tgt).astype(jnp.float32) * mask)
    return jnp.sum(losses * mask) / jnp.sum(mask), f, t


if __name__ == "__main__":
    B, T, C = 2, 8, 32  # batch, time (== max(lengths)), num classes
    key = jax.random.PRNGKey(0)
    k1, k2 = jax.random.split(key)

    inputs = jax.random.normal(k1, (B, T, C), dtype=jnp.float32)
    target = jax.random.randint(k2, (B, T), 0, C, dtype=jnp.int32)
    lengths = jnp.array([T, 5], dtype=jnp.int32)  # max(lengths) == T, matching torch semantics

    loss, f, t = masked_cross_entropy_loss(inputs, target, lengths)
    jax.block_until_ready((loss, f, t))

    loss_r, f_r, t_r = _reference(inputs, target, lengths)
    assert jnp.allclose(loss, loss_r, rtol=1e-5, atol=1e-5), (loss, loss_r)
    assert jnp.allclose(f, f_r) and jnp.allclose(t, t_r), (f, f_r, t, t_r)

    print("KERNEL_OK")
</pallas_src>

<mosaic_0001>
module attributes {stable_mosaic.version = 11 : i64} {
  func.func @_masked_ce_kernel(%arg0: i32, %arg1: memref<16x32xf32, #tpu.memory_space<vmem>>, %arg2: memref<16x1xi32, #tpu.memory_space<vmem>>, %arg3: memref<1x1x128xf32, #tpu.memory_space<vmem>>) attributes {dimension_semantics = [#tpu.dimension_semantics<parallel>], iteration_bounds = array<i64: 1>, scalar_prefetch = 0 : i64, scratch_operands = 0 : i64, tpu.core_type = #tpu.core_type<tc>, window_params = [{transform_indices = @transform_0, window_bounds = array<i64: 16, 32>}, {transform_indices = @transform_1, window_bounds = array<i64: 16, 1>}, {transform_indices = @transform_2, window_bounds = array<i64: 1, 1, 128>}]} {
    %c0 = arith.constant 0 : index
    %c0_0 = arith.constant 0 : index
    %0 = vector.load %arg1[%c0, %c0_0] : memref<16x32xf32, #tpu.memory_space<vmem>>, vector<16x32xf32>
    %c0_1 = arith.constant 0 : index
    %c0_2 = arith.constant 0 : index
    %1 = vector.load %arg2[%c0_1, %c0_2] : memref<16x1xi32, #tpu.memory_space<vmem>>, vector<16x1xi32>
    %c16_i32 = arith.constant 16 : i32
    %2 = arith.muli %arg0, %c16_i32 : i32
    %3 = tpu.iota {dimensions = array<i32: 0>} : vector<16x1xi32>
    %4 = vector.broadcast %2 : i32 to vector<16x1xi32>
    %5 = arith.addi %4, %3 : vector<16x1xi32>
    %c0_i32 = arith.constant 0 : i32
    %6 = vector.broadcast %c0_i32 : i32 to vector<16x1xi32>
    %7 = arith.cmpi sge, %1, %6 : vector<16x1xi32>
    %c16_i32_3 = arith.constant 16 : i32
    %8 = vector.broadcast %c16_i32_3 : i32 to vector<16x1xi32>
    %9 = arith.cmpi slt, %5, %8 : vector<16x1xi32>
    %10 = arith.andi %7, %9 : vector<16x1xi1>
    %cst = arith.constant dense<0xFF800000> : vector<16xf32>
    %11 = vector.multi_reduction <maximumf>, %0, %cst [1] : vector<16x32xf32> to vector<16xf32>
    %12 = vector.shape_cast %11 : vector<16xf32> to vector<16x1xf32>
    %13 = vector.broadcast %12 : vector<16x1xf32> to vector<16x32xf32>
    %14 = arith.subf %0, %13 : vector<16x32xf32>
    %15 = math.exp %14 : vector<16x32xf32>
    %cst_4 = arith.constant dense<0.000000e+00> : vector<16xf32>
    %16 = vector.multi_reduction <add>, %15, %cst_4 [1] : vector<16x32xf32> to vector<16xf32>
    %17 = vector.shape_cast %16 : vector<16xf32> to vector<16x1xf32>
    %18 = math.log %17 : vector<16x1xf32>
    %19 = arith.addf %18, %12 : vector<16x1xf32>
    %20 = tpu.iota {dimensions = array<i32: 1>} : vector<16x32xi32>
    %21 = vector.broadcast %1 : vector<16x1xi32> to vector<16x32xi32>
    %22 = arith.cmpi eq, %20, %21 : vector<16x32xi32>
    %cst_5 = arith.constant 0xFF800000 : f32
    %23 = vector.broadcast %cst_5 : f32 to vector<16x32xf32>
    %24 = arith.select %22, %0, %23 : vector<16x32xi1>, vector<16x32xf32>
    %cst_6 = arith.constant dense<0xFF800000> : vector<16xf32>
    %25 = vector.multi_reduction <maximumf>, %24, %cst_6 [1] : vector<16x32xf32> to vector<16xf32>
    %26 = vector.shape_cast %25 : vector<16xf32> to vector<16x1xf32>
    %27 = arith.subf %19, %26 : vector<16x1xf32>
    %28 = vector.broadcast %12 : vector<16x1xf32> to vector<16x32xf32>
    %29 = arith.cmpf oeq, %0, %28 : vector<16x32xf32>
    %c32_i32 = arith.constant 32 : i32
    %30 = vector.broadcast %c32_i32 : i32 to vector<16x32xi32>
    %31 = arith.select %29, %20, %30 : vector<16x32xi1>, vector<16x32xi32>
    %cst_7 = arith.constant dense<2147483647> : vector<16xi32>
    %32 = vector.multi_reduction <minsi>, %31, %cst_7 [1] : vector<16x32xi32> to vector<16xi32>
    %33 = vector.shape_cast %32 : vector<16xi32> to vector<16x1xi32>
    %34 = arith.cmpi eq, %33, %1 : vector<16x1xi32>
    %cst_8 = arith.constant 0.000000e+00 : f32
    %35 = vector.broadcast %cst_8 : f32 to vector<16x1xf32>
    %36 = arith.select %10, %27, %35 : vector<16x1xi1>, vector<16x1xf32>
    %37 = vector.shape_cast %36 : vector<16x1xf32> to vector<1x16x1xf32>
    %cst_9 = arith.constant dense<0.000000e+00> : vector<1xf32>
    %38 = vector.multi_reduction <add>, %37, %cst_9 [1, 2] : vector<1x16x1xf32> to vector<1xf32>
    %39 = vector.shape_cast %38 : vector<1xf32> to vector<1x1x1xf32>
    %40 = vector.extract %39[0, 0, 0] : f32 from vector<1x1x1xf32>
    %41 = arith.andi %34, %10 : vector<16x1xi1>
    %cst_10 = arith.constant 1.000000e+00 : f32
    %cst_11 = arith.constant 0.000000e+00 : f32
    %42 = vector.broadcast %cst_10 : f32 to vector<16x1xf32>
    %43 = vector.broadcast %cst_11 : f32 to vector<16x1xf32>
    %44 = arith.select %41, %42, %43 : vector<16x1xi1>, vector<16x1xf32>
    %45 = vector.shape_cast %44 : vector<16x1xf32> to vector<1x16x1xf32>
    %cst_12 = arith.constant dense<0.000000e+00> : vector<1xf32>
    %46 = vector.multi_reduction <add>, %45, %cst_12 [1, 2] : vector<1x16x1xf32> to vector<1xf32>
    %47 = vector.shape_cast %46 : vector<1xf32> to vector<1x1x1xf32>
    %48 = vector.extract %47[0, 0, 0] : f32 from vector<1x1x1xf32>
    %49 = tpu.iota {dimensions = array<i32: 2>} : vector<1x1x128xi32>
    %c0_i32_13 = arith.constant 0 : i32
    %50 = vector.broadcast %c0_i32_13 : i32 to vector<1x1x128xi32>
    %51 = arith.cmpi eq, %49, %50 : vector<1x1x128xi32>
    %c1_i32 = arith.constant 1 : i32
    %52 = vector.broadcast %c1_i32 : i32 to vector<1x1x128xi32>
    %53 = arith.cmpi eq, %49, %52 : vector<1x1x128xi32>
    %cst_14 = arith.constant 0.000000e+00 : f32
    %54 = vector.broadcast %48 : f32 to vector<1x1x128xf32>
    %55 = vector.broadcast %cst_14 : f32 to vector<1x1x128xf32>
    %56 = arith.select %53, %54, %55 : vector<1x1x128xi1>, vector<1x1x128xf32>
    %57 = vector.broadcast %40 : f32 to vector<1x1x128xf32>
    %58 = arith.select %51, %57, %56 : vector<1x1x128xi1>, vector<1x1x128xf32>
    %c0_15 = arith.constant 0 : index
    %c0_16 = arith.constant 0 : index
    %c0_17 = arith.constant 0 : index
    %59 = vector.load %arg3[%c0_15, %c0_16, %c0_17] : memref<1x1x128xf32, #tpu.memory_space<vmem>>, vector<1x1x128xf32>
    tpu.vector_store %arg3[%c0_15, %c0_16, %c0_17], %58 {strides = array<i32>} : memref<1x1x128xf32, #tpu.memory_space<vmem>>, vector<1x1x128xf32>,
    return
  }
  func.func @transform_0(%arg0: i32) -> (i32, i32) {
    %c0_i32 = arith.constant 0 : i32
    %c0_i32_0 = arith.constant 0 : i32
    return %arg0, %c0_i32 : i32, i32
  }
  func.func @transform_1(%arg0: i32) -> (i32, i32) {
    %c0_i32 = arith.constant 0 : i32
    %c0_i32_0 = arith.constant 0 : i32
    return %arg0, %c0_i32 : i32, i32
  }
  func.func @transform_2(%arg0: i32) -> (i32, i32, i32) {
    %c0_i32 = arith.constant 0 : i32
    %c0_i32_0 = arith.constant 0 : i32
    %c0_i32_1 = arith.constant 0 : i32
    return %arg0, %c0_i32, %c0_i32_0 : i32, i32, i32
  }
}

</mosaic_0001>

<bundles_post_ra>
// kernel: tpu_custom_call.1
= control target key start
LH: loop header
LB: loop body
LE: loop exit
PB: predicated region body
PF: predicated region fallthrough
CT: control target
= control target key end

     0   :  { %vm29_vm0 = vcmask 261120   ;;  %v203_v3 = vmov 0   ;;  %s281_s0 = inlined_call_operand.vmem [shape: f32[16,32], index: 0, kind: input, shape index: {}]   ;;  %s282_s1 = inlined_call_operand.vmem [shape: s32[16,1], index: 1, kind: input, shape index: {}]   ;;  %s283_s2 = inlined_call_operand.hbm [shape: f32[1,1,128], index: 2, kind: output, shape index: {}]  }
   0x1   :  { %v12_v0 = vld [vmem:[%s281_s0] sm:$0xff]  ;;  %v13_v1 = vld [vmem:[%s281_s0 + $0x8] sm:$0xff]  ;;  %169 = vset.pattern.permute.xlu0 %v203_v3  ;;  %170 = vset.pattern.permute.xlu1 %v203_v3 }
   0x2   :  { %v30_v2 = vsel %vm29_vm0, %v12_v0, -inf }
   0x3   :  { %7 = vsyncpa [#allocation3], 0  ;;  %31 = vmax.xlane.f32.xlu0 %v30_v2  ;;  %v33_v4 = vsel %vm29_vm0, %v13_v1, -inf  ;;  %v232_v5 = vld [vmem:[%s282_s1] sm:$0xff]  ;;  %v54_v6 = vlaneseq  ;;  %v252_v22 = vld [vmem:[%s282_s1 + $0x8] sm:$0xff]  ;;  %v204_v62 = vmov 0.0  }
   0x4   :  { %vm23_vm7 = vcmp.ge.s32.totalorder %v232_v5, 0  ;;  %vm24_vm10 = vcmp.ge.s32.totalorder %v252_v22, 0  ;;  %vm112_vm12 = vcmask 7168   ;;  %s205_s16 = smov [#allocation2]  }
   0x5   :  { %v235_v7 = vand.u32 127, %v54_v6  ;;  %s154_s17 = sshll.u32 %s205_s16, 4  ;;  %s155_s17 = int_to_ptr.vmem [resolvable:$true] %s154_s17 }
   0x6   :  { %s179_s19 = scalar_lea.vmem %s155_s17, 16  ;;  %s183_s20 = scalar_lea.vmem %s155_s17, 32 }
   0x7   :  { %34 = vmax.xlane.f32.xlu0 %v33_v4  ;;  %vm142_vm14 = vcmp.eq.s32.totalorder %v235_v7, 1  ;;  %vm141_vm15 = vcmp.eq.s32.totalorder %v235_v7, 0  ;;  %p180_p0 = scmp.ne.s32.totalorder %s155_s17, %s179_s19  ;;  %p184_p1 = scmp.lt.s32.totalorder %s155_s17, %s155_s17 }
   0x8   :  { %p185_p2 = scmp.lt.s32.totalorder %s183_s20, %s179_s19 }
   0xa   :  { %p186_p3 = por %p185_p2, %p184_p1 }
   0xc   :  { %p187_p4 = pnand %p186_p3, %p180_p0 }
  0x1d   :  { %57 = vperm.xlu0 %169, %v232_v5  }
  0x90   :  { %v237_v8 = vpop.xlane.xlu0 %31 }
  0x91   :  { %vm74_vm1 = vcmp.eq.f32.partialorder %v12_v0, %v237_v8  ;;  %v36_v23 = vsub.f32 %v12_v0, %v237_v8 }
  0x92   :  { %v76_v9 = vsel %vm74_vm1, %v235_v7, 32 }
  0x93   :  { %v78_v10 = vsel %vm29_vm0, %v76_v9, 2147483647  ;;  %v38_v24 = vmul.f32 1.442695, %v36_v23 }
  0x94   :  { %v242_v11 = vpop.xlane.xlu0 %34  ;;  %v80_v12 = vshra.s32 %v78_v10, 16  ;;  %v79_v30 = vand.u32 65535, %v78_v10 }
  0x95   :  { %v37_v13 = vsub.f32 %v13_v1, %v242_v11  ;;  %vm75_vm2 = vcmp.eq.f32.partialorder %v13_v1, %v242_v11 }
  0x96   :  { %v82_v14 = vcvt.s32.f32 %v80_v12  ;;  %v77_v15 = vsel %vm75_vm2, %v235_v7, 32  ;;  %v81_v32 = vcvt.s32.f32 %v79_v30 }
  0x97   :  { %v40_v16 = vmul.f32 1.442695, %v37_v13  ;;  %v93_v17 = vsel %vm29_vm0, %v77_v15, 2147483647 }
  0x98   :  { %83 = vmin.xlane.f32.xlu1 %v82_v14  ;;  %v95_v18 = vshra.s32 %v93_v17, 16  ;;  %v94_v33 = vand.u32 65535, %v93_v17 }
  0x99   :  { %171 = vpow2.f32 %v40_v16 }
  0x9a   :  { %v97_v19 = vcvt.s32.f32 %v95_v18  ;;  %173 = vpow2.f32 %v38_v24  ;;  %v96_v36 = vcvt.s32.f32 %v94_v33 }
  0x9c   :  { %98 = vmin.xlane.f32.xlu1 %v97_v19  ;;  %v58_v25 = vpop.permute.xlu0 %57 }
  0x9d   :  { %vm62_vm3 = vcmp.eq.s32.totalorder %v235_v7, %v58_v25 }
  0x9e   :  { %v64_v27 = vsel %vm62_vm3, %v12_v0, -inf }
  0x9f   :  { %v66_v29 = vsel %vm29_vm0, %v64_v27, -inf }
  0xa3   :  { %v172_v20 = vpop.eup %171 }
  0xa4   :  { %v45_v21 = vsel %vm29_vm0, %v172_v20, 0.0  ;;  %v174_v26 = vpop.eup %173 }
  0xa5   :  { %46 = vadd.xlane.f32.xlu0 %v45_v21  ;;  %v42_v28 = vsel %vm29_vm0, %v174_v26, 0.0 }
  0xad   :  { %60 = vperm.xlu1 %170, %v252_v22  }
  0xd1   :  { %43 = vadd.xlane.f32.xlu1 %v42_v28 }
  0xd5   :  { %67 = vmax.xlane.f32.xlu1 %v66_v29 }
 0x125   :  { %v84_v31 = vpop.xlane.xlu1 %83 }
 0x126   :  { %vm85_vm4 = vcmp.eq.f32.partialorder %v82_v14, %v84_v31  ;;  %v90_v45 = vcvt.f32.s32 %v84_v31 }
 0x127   :  { %v86_v34 = vsel %vm85_vm4, %v81_v32, inf }
 0x128   :  { %87 = vmin.xlane.f32.xlu1 %v86_v34  ;;  %v91_v49 = vshll.u32 %v90_v45, 16 }
 0x129   :  { %v99_v35 = vpop.xlane.xlu1 %98 }
 0x12a   :  { %vm100_vm5 = vcmp.eq.f32.partialorder %v97_v19, %v99_v35  ;;  %v105_v50 = vcvt.f32.s32 %v99_v35 }
 0x12b   :  { %v101_v37 = vsel %vm100_vm5, %v96_v36, inf }
 0x12c   :  { %102 = vmin.xlane.f32.xlu1 %v101_v37  ;;  %v106_v56 = vshll.u32 %v105_v50, 16 }
 0x12d   :  { %v61_v38 = vpop.permute.xlu1 %60 }
 0x12e   :  { %vm63_vm6 = vcmp.eq.s32.totalorder %v235_v7, %v61_v38 }
 0x12f   :  { %v65_v39 = vsel %vm63_vm6, %v13_v1, -inf }
 0x130   :  { %v69_v40 = vsel %vm29_vm0, %v65_v39, -inf }
 0x131   :  { %70 = vmax.xlane.f32.xlu1 %v69_v40 }
 0x132   :  { %v47_v42 = vpop.xlane.xlu0 %46 }
 0x15e   :  { %v44_v41 = vpop.xlane.xlu1 %43 }
 0x15f   :  { %175 = vlog2.f32 %v44_v41 }
 0x160   :  { %177 = vlog2.f32 %v47_v42 }
 0x162   :  { %v68_v44 = vpop.xlane.xlu1 %67 }
 0x169   :  { %v176_v43 = vpop.eup %175 }
 0x16a   :  { %v49_v46 = vmul.f32 0.6931472, %v176_v43  ;;  %v178_v48 = vpop.eup %177 }
 0x16b   :  { %v51_v54 = vmul.f32 0.6931472, %v178_v48 }
 0x16c   :  { %v52_v52 = vadd.f32 %v49_v46, %v237_v8 }
 0x16d   :  { %v53_v60 = vadd.f32 %v51_v54, %v242_v11 }
 0x16e   :  { %v72_v58 = vsub.f32 %v52_v52, %v68_v44 }
 0x170   :  { %v110_v0 = vsel %vm23_vm7, %v72_v58, 0.0 }
 0x171   :  { %v113_v6 = vsel %vm112_vm12, %v110_v0, 0.0 }
 0x1b5   :  { %v88_v47 = vpop.xlane.xlu1 %87 }
 0x1b6   :  { %v89_v51 = vcvt.f32.s32 %v88_v47 }
 0x1b8   :  { %v92_v53 = vadd.s32 %v91_v49, %v89_v51 }
 0x1b9   :  { %v103_v55 = vpop.xlane.xlu1 %102 }
 0x1ba   :  { %vm108_vm8 = vcmp.eq.s32.totalorder %v92_v53, %v232_v5  ;;  %v104_v57 = vcvt.f32.s32 %v103_v55 }
 0x1bb   :  { %vm125_vm9 = vmand %vm108_vm8, %vm23_vm7 }
 0x1bc   :  { %v107_v59 = vadd.s32 %v106_v56, %v104_v57  ;;  %v127_v63 = vsel %vm125_vm9, 1.0, %v204_v62 }
 0x1bd   :  { %v129_v4 = vsel %vm112_vm12, %v127_v63, 0.0 }
 0x1be   :  { %vm109_vm11 = vcmp.eq.s32.totalorder %v107_v59, %v252_v22  ;;  %v71_v61 = vpop.xlane.xlu1 %70 }
 0x1bf   :  { %v73_v1 = vsub.f32 %v53_v60, %v71_v61  ;;  %vm126_vm13 = vmand %vm109_vm11, %vm24_vm10 }
 0x1c0   :  { %v128_v2 = vsel %vm126_vm13, 1.0, %v204_v62 }
 0x1c1   :  { %v111_v3 = vsel %vm24_vm10, %v73_v1, 0.0  ;;  %v130_v5 = vsel %vm112_vm12, %v128_v2, 0.0 }
 0x1c2   :  { %v114_v8 = vsel %vm112_vm12, %v111_v3, 0.0  ;;  %v131_v9 = vadd.f32 %v130_v5, %v129_v4 }
 0x1c3   :  { %v115_v10 = vadd.f32 %v114_v8, %v113_v6 }
 0x1c5   :  { %116 = vadd.xlane.f32.xlu1 %v115_v10 }
 0x1c9   :  { %132 = vadd.xlane.f32.xlu1 %v131_v9 }
 0x252   :  { %v117_v11 = vpop.xlane.xlu1 %116 }
 0x253   :  { %v118_v12 = vrot.slane %v117_v11, 4 }
 0x255   :  { %v119_v13 = vadd.f32 %v118_v12, %v117_v11 }
 0x256   :  { %v133_v14 = vpop.xlane.xlu1 %132 }
 0x257   :  { %v120_v15 = vrot.slane %v119_v13, 2  ;;  %v134_v16 = vrot.slane %v133_v14, 4 }
 0x259   :  { %v135_v17 = vadd.f32 %v134_v16, %v133_v14  ;;  %v121_v18 = vadd.f32 %v120_v15, %v119_v13 }
 0x25b   :  { %v136_v19 = vrot.slane %v135_v17, 2  ;;  %v122_v20 = vrot.slane %v121_v18, 1 }
 0x25d   :  { %v137_v21 = vadd.f32 %v136_v19, %v135_v17  ;;  %v123_v22 = vadd.f32 %v122_v20, %v121_v18 }
 0x25f   :  { %162 = vpush %v123_v22  ;;  %v138_v23 = vrot.slane %v137_v21, 1 }
 0x261   :  { %v139_v24 = vadd.f32 %v138_v23, %v137_v21 }
 0x263   :  { %164 = vpush %v139_v24 }
 0x290   :  { %s163_s1 = spop %162 }
 0x291   :  { %v145_v26 = vstv %s163_s1 }
 0x294   :  { %s165_s18 = spop %164 }
 0x295   :  { %v143_v25 = vstv %s165_s18 }
 0x296   :  { %v144_v27 = vsel %vm142_vm14, %v143_v25, 0.0 }
 0x297   :  { %v146_v28 = vsel %vm141_vm15, %v145_v26, %v144_v27 }
 0x298   :  { %147 = vst [vmem:[#allocation2] sm:$0x1] %v146_v28 }
 0x299   :  { %190 = shalt.err (!%p187_p4)
}
 0x29a   :  { %s191_s23 = scalar_lea.hbm %s283_s2, 16 }
 0x29b   :  { %p192_p5 = scmp.ne.s32.totalorder %s283_s2, %s191_s23  ;;  %p195_p6 = scmp.lt.u32.totalorder %s191_s23, %s283_s2 }
 0x29d   :  { %p197_p7 = pnand %p195_p6, %p192_p5 }
 0x29f   :  { %200 = shalt.err (!%p197_p7)
}
 0x2a0   :  { %157 = dma.vmem_to_hbm [thread:$0]  %s155_s17, 16, %s283_s2, [#allocation3]  }
 0x2a1   :  { %201 = dma.done.wait [#allocation3], 16  }
 0x2a2   :  { %202 = vsyncadd [#allocation3], 4294967280 }
 0x2a3   :  { %161 = vsyncpa [#allocation3], 1 }

</bundles_post_ra>
